<compile_context>
chip_gen: v6e
topology: v6e:2x2x1
jax: 0.10.0
libtpu: 0.0.40
codegen_flags: <defaults>
</compile_context>

<pallas_src>
import functools

import jax
import jax.numpy as jnp
from jax.experimental import pallas as pl
from jax.experimental.pallas import tpu as pltpu


_LN_EPS = 1e-5  # torch.nn.LayerNorm default


def _layer_norm(x, gamma, beta):
    mu = jnp.mean(x, axis=-1, keepdims=True)
    xc = x - mu
    var = jnp.mean(xc * xc, axis=-1, keepdims=True)
    return xc * jax.lax.rsqrt(var + _LN_EPS) * gamma + beta


def _gelu(x):
    # TODO(synk): torch.nn.GELU() default is the exact erf form; the tanh
    # approximation (max abs err ~3e-4) is used to guarantee Mosaic lowering.
    c = 0.7978845608028654  # sqrt(2/pi)
    return 0.5 * x * (1.0 + jnp.tanh(c * (x + 0.044715 * x * x * x)))


def _encoder_block_kernel(head_num, x_ref, wqkv_ref, wo_ref,
                          ln1_g_ref, ln1_b_ref, w1_ref, b1_ref,
                          w2_ref, b2_ref, ln2_g_ref, ln2_b_ref, o_ref):
    Bb, T, E = x_ref.shape
    H = head_num
    Dh = E // H
    mm_dtype = wqkv_ref.dtype      # bf16 on v6e/v7x production, f32 in the demo

    x2d = x_ref[...].reshape(Bb * T, E)
    x_f32 = x2d.astype(jnp.float32)

    # --- fused, lane-dense QKV projection: one (Bb*T, E) @ (E, 3E) MXU push.
    # sqrt(Dh) attention scale is pre-folded into the Q columns wrapper-side.
    qkv = jnp.dot(x2d.astype(mm_dtype), wqkv_ref[...],
                  preferred_element_type=jnp.float32)                 # (Bb*T, 3E)
    qkv = qkv.reshape(Bb, T, 3 * E)

    # --- attention: heads are a short static unroll; each dot is batched over Bb.
    ctx_heads = []
    for h in range(H):
        q = qkv[:, :, h * Dh:(h + 1) * Dh]                            # (Bb, T, Dh)
        k = qkv[:, :, E + h * Dh:E + (h + 1) * Dh]
        v = qkv[:, :, 2 * E + h * Dh:2 * E + (h + 1) * Dh]
        e = jax.lax.dot_general(q, k, (((2,), (2,)), ((0,), (0,))),
                                preferred_element_type=jnp.float32)   # (Bb, T, T)
        e = e - jnp.max(e, axis=-1, keepdims=True)
        p = jnp.exp(e)
        # approx=True moves this onto the EUP slot; kept exact here to match the
        # f32 reference bit-closely at the demo tolerance.
        p = p * pl.reciprocal(jnp.sum(p, axis=-1, keepdims=True), approx=False)
        ctx_heads.append(
            jax.lax.dot_general(p.astype(mm_dtype), v.astype(mm_dtype),
                                (((2,), (1,)), ((0,), (0,))),
                                preferred_element_type=jnp.float32))  # (Bb, T, Dh)

    # concat heads -> '(h d)' feature order, then ONE full-width output projection
    ctx = jnp.concatenate(ctx_heads, axis=-1).reshape(Bb * T, E)
    attn_out = jnp.dot(ctx.astype(mm_dtype), wo_ref[...],
                       preferred_element_type=jnp.float32)            # (Bb*T, E)

    # --- residual + LayerNorm1 (dropout p=0.1 is identity at inference) ---
    x1 = _layer_norm(x_f32 + attn_out,
                     ln1_g_ref[...].astype(jnp.float32),
                     ln1_b_ref[...].astype(jnp.float32))

    # --- MLP: Linear -> GELU -> Linear (dropouts identity at inference) ---
    hid = jnp.dot(x1.astype(mm_dtype), w1_ref[...],
                  preferred_element_type=jnp.float32) + b1_ref[...].astype(jnp.float32)
    hid = _gelu(hid)
    mlp = jnp.dot(hid.astype(mm_dtype), w2_ref[...],
                  preferred_element_type=jnp.float32) + b2_ref[...].astype(jnp.float32)

    # --- residual + LayerNorm2 ---
    x2 = _layer_norm(x1 + mlp,
                     ln2_g_ref[...].astype(jnp.float32),
                     ln2_b_ref[...].astype(jnp.float32))
    o_ref[...] = x2.reshape(Bb, T, E).astype(o_ref.dtype)


def _const_spec(shape):
    """Full-array block with a constant index_map -> DMA'd once, VMEM-resident.
    For production-size weights on v7x (64 MiB VMEM) consider bf16 weights
    and/or pipeline_mode=pl.Buffered(1) so resident weights aren't double-buffered."""
    zeros = (0,) * len(shape)
    return pl.BlockSpec(shape, lambda b: zeros)


def pack_qkv_weight(w_qkv, head_num):
    """Repack the fused qkv weight (input feature ordering 'd k h', as sliced by
    the reference rearrange) into a lane-dense [Q | K | V] layout with per-head
    columns ordered (h outer, d inner), and fold the sqrt(Dh) attention scale
    into the Q columns.  One-time constant transform (weight prep, not hot path)."""
    E = w_qkv.shape[0]
    H = head_num
    Dh = E // H
    w = w_qkv.reshape(E, Dh, 3, H)                  # (in, d, k, h)
    w = jnp.transpose(w, (0, 2, 3, 1))              # (in, k, h, d)
    scale = jnp.array([Dh ** 0.5, 1.0, 1.0], w.dtype).reshape(1, 3, 1, 1)
    return (w * scale).reshape(E, 3 * E)


def transformer_encoder_block(x, w_qkv_dense, w_out, ln1_g, ln1_b,
                              w1, b1, w2, b2, ln2_g, ln2_b,
                              *, head_num, block_b=None):
    """x: (B, T, E). w_qkv_dense: (E, 3E) from pack_qkv_weight. w_out: (E, E).
    All linear weights are (in_features, out_features).  Pass bf16 weights (and
    optionally bf16 x) for MXU-native matmuls on v6e/v7x; LN/softmax/GELU stay f32."""
    B, T, E = x.shape
    M = w1.shape[1]

    if block_b is None:
        block_b = max(1, min(B, 128 // max(T, 1)))  # target ~128 rows per grid step
    while B % block_b:                              # keep full blocks only
        block_b -= 1
    grid = (B // block_b,)

    kernel = functools.partial(_encoder_block_kernel, head_num)
    return pl.pallas_call(
        kernel,
        out_shape=jax.ShapeDtypeStruct((B, T, E), x.dtype),
        grid=grid,
        in_specs=[
            pl.BlockSpec((block_b, T, E), lambda b: (b, 0, 0)),   # x: block of sequences
            _const_spec((E, 3 * E)),                              # packed qkv weight
            _const_spec((E, E)),                                  # out-proj weight
            _const_spec((1, E)), _const_spec((1, E)),             # ln1 gamma/beta
            _const_spec((E, M)), _const_spec((1, M)),             # w1, b1
            _const_spec((M, E)), _const_spec((1, E)),             # w2, b2
            _const_spec((1, E)), _const_spec((1, E)),             # ln2 gamma/beta
        ],
        out_specs=pl.BlockSpec((block_b, T, E), lambda b: (b, 0, 0)),
        compiler_params=pltpu.CompilerParams(
            dimension_semantics=("parallel",),   # batch-block axis shards across TCs
        ),
    )(x, w_qkv_dense, w_out, ln1_g, ln1_b, w1, b1, w2, b2, ln2_g, ln2_b)


def _ref_forward(x, w_qkv, w_out, ln1_g, ln1_b, w1, b1, w2, b2, ln2_g, ln2_b,
                 head_num):
    """Pure-JAX reference of the torch module's math (uses the RAW fused qkv weight
    and the reference's 'b t (d k h) -> k b h t d' split), for correctness check."""
    B, T, E = x.shape
    H = head_num
    Dh = E // H
    qkv = x @ w_qkv                                     # (B, T, 3E), features (d, k, h)
    qkv = qkv.reshape(B, T, Dh, 3, H)
    qkv = jnp.transpose(qkv, (3, 0, 4, 1, 2))           # (k, B, H, T, Dh)
    q, k, v = qkv[0], qkv[1], qkv[2]
    e = jnp.einsum('bhid,bhjd->bhij', q, k) * (Dh ** 0.5)   # reference MULTIPLIES by sqrt(Dh)
    a = jax.nn.softmax(e, axis=-1)
    ctx = jnp.einsum('bhij,bhjd->bhid', a, v)
    ctx = jnp.transpose(ctx, (0, 2, 1, 3)).reshape(B, T, E)  # 'b h t d -> b t (h d)'
    attn_out = ctx @ w_out
    x1 = _layer_norm(x + attn_out, ln1_g, ln1_b)
    hid = _gelu(x1 @ w1 + b1)
    mlp = hid @ w2 + b2
    return _layer_norm(x1 + mlp, ln2_g, ln2_b)


if __name__ == "__main__":
    key = jax.random.PRNGKey(0)
    ks = jax.random.split(key, 8)

    B, T, E, H, M = 2, 8, 32, 4, 64
    Dh = E // H

    x = jax.random.normal(ks[0], (B, T, E), jnp.float32)
    # Weights in (in_features, out_features) orientation (kernel computes x @ W).
    w_qkv = jax.random.normal(ks[1], (E, 3 * E), jnp.float32) * (E ** -0.5)
    w_out = jax.random.normal(ks[2], (E, E), jnp.float32) * (E ** -0.5)
    w1 = jax.random.normal(ks[3], (E, M), jnp.float32) * (E ** -0.5)
    b1 = jax.random.normal(ks[4], (1, M), jnp.float32) * 0.1
    w2 = jax.random.normal(ks[5], (M, E), jnp.float32) * (M ** -0.5)
    b2 = jax.random.normal(ks[6], (1, E), jnp.float32) * 0.1
    ln1_g = jnp.ones((1, E), jnp.float32)
    ln1_b = jnp.zeros((1, E), jnp.float32)
    ln2_g = jnp.ones((1, E), jnp.float32)
    ln2_b = jnp.zeros((1, E), jnp.float32)

    # One-time weight prep: lane-dense packed QKV with sqrt(Dh) folded into Q.
    w_qkv_dense = pack_qkv_weight(w_qkv, H)

    y = jax.block_until_ready(
        transformer_encoder_block(x, w_qkv_dense, w_out, ln1_g, ln1_b,
                                  w1, b1, w2, b2, ln2_g, ln2_b, head_num=H))

    y_ref = _ref_forward(x, w_qkv, w_out, ln1_g, ln1_b,
                         w1, b1, w2, b2, ln2_g, ln2_b, H)

    assert y.shape == (B, T, E) and y.dtype == x.dtype
    assert bool(jnp.allclose(y, y_ref, atol=1e-3, rtol=1e-3)), \
        float(jnp.max(jnp.abs(y - y_ref)))

    print("KERNEL_OK")
</pallas_src>

<mosaic_0001>
module attributes {stable_mosaic.version = 11 : i64} {
  func.func @_encoder_block_kernel(%arg0: i32, %arg1: memref<2x8x32xf32, #tpu.memory_space<vmem>>, %arg2: memref<32x96xf32, #tpu.memory_space<vmem>>, %arg3: memref<32x32xf32, #tpu.memory_space<vmem>>, %arg4: memref<1x32xf32, #tpu.memory_space<vmem>>, %arg5: memref<1x32xf32, #tpu.memory_space<vmem>>, %arg6: memref<32x64xf32, #tpu.memory_space<vmem>>, %arg7: memref<1x64xf32, #tpu.memory_space<vmem>>, %arg8: memref<64x32xf32, #tpu.memory_space<vmem>>, %arg9: memref<1x32xf32, #tpu.memory_space<vmem>>, %arg10: memref<1x32xf32, #tpu.memory_space<vmem>>, %arg11: memref<1x32xf32, #tpu.memory_space<vmem>>, %arg12: memref<2x8x32xf32, #tpu.memory_space<vmem>>) attributes {dimension_semantics = [#tpu.dimension_semantics<parallel>], iteration_bounds = array<i64: 1>, scalar_prefetch = 0 : i64, scratch_operands = 0 : i64, tpu.core_type = #tpu.core_type<tc>, window_params = [{transform_indices = @transform_0, window_bounds = array<i64: 2, 8, 32>}, {pipeline_mode = #tpu.pipeline_mode<synchronous>, transform_indices = @transform_1, window_bounds = array<i64: 32, 96>}, {pipeline_mode = #tpu.pipeline_mode<synchronous>, transform_indices = @transform_2, window_bounds = array<i64: 32, 32>}, {pipeline_mode = #tpu.pipeline_mode<synchronous>, transform_indices = @transform_3, window_bounds = array<i64: 1, 32>}, {pipeline_mode = #tpu.pipeline_mode<synchronous>, transform_indices = @transform_4, window_bounds = array<i64: 1, 32>}, {pipeline_mode = #tpu.pipeline_mode<synchronous>, transform_indices = @transform_5, window_bounds = array<i64: 32, 64>}, {pipeline_mode = #tpu.pipeline_mode<synchronous>, transform_indices = @transform_6, window_bounds = array<i64: 1, 64>}, {pipeline_mode = #tpu.pipeline_mode<synchronous>, transform_indices = @transform_7, window_bounds = array<i64: 64, 32>}, {pipeline_mode = #tpu.pipeline_mode<synchronous>, transform_indices = @transform_8, window_bounds = array<i64: 1, 32>}, {pipeline_mode = #tpu.pipeline_mode<synchronous>, transform_indices = @transform_9, window_bounds = array<i64: 1, 32>}, {pipeline_mode = #tpu.pipeline_mode<synchronous>, transform_indices = @transform_10, window_bounds = array<i64: 1, 32>}, {transform_indices = @transform_11, window_bounds = array<i64: 2, 8, 32>}]} {
    %c0 = arith.constant 0 : index
    %c0_0 = arith.constant 0 : index
    %c0_1 = arith.constant 0 : index
    %0 = vector.load %arg1[%c0, %c0_0, %c0_1] : memref<2x8x32xf32, #tpu.memory_space<vmem>>, vector<2x8x32xf32>
    %1 = vector.shape_cast %0 : vector<2x8x32xf32> to vector<16x32xf32>
    %c0_2 = arith.constant 0 : index
    %c0_3 = arith.constant 0 : index
    %2 = vector.load %arg2[%c0_2, %c0_3] : memref<32x96xf32, #tpu.memory_space<vmem>>, vector<32x96xf32>
    %cst = arith.constant dense<0.000000e+00> : vector<16x96xf32>
    %3 = tpu.matmul %1, %2, %cst {dimension_numbers = #tpu.dot_dimension_numbers<[1], [0], [0], [1], [0, 0, 1, 1], [], []>} : vector<16x32xf32>, vector<32x96xf32>, vector<16x96xf32> -> vector<16x96xf32>
    %4 = vector.shape_cast %3 : vector<16x96xf32> to vector<2x8x96xf32>
    %5 = vector.extract_strided_slice %4 {offsets = [0, 0, 0], sizes = [2, 8, 8], strides = [1, 1, 1]} : vector<2x8x96xf32> to vector<2x8x8xf32>
    %6 = vector.extract_strided_slice %4 {offsets = [0, 0, 32], sizes = [2, 8, 8], strides = [1, 1, 1]} : vector<2x8x96xf32> to vector<2x8x8xf32>
    %7 = vector.extract_strided_slice %4 {offsets = [0, 0, 64], sizes = [2, 8, 8], strides = [1, 1, 1]} : vector<2x8x96xf32> to vector<2x8x8xf32>
    %cst_4 = arith.constant dense<0.000000e+00> : vector<2x8x8xf32>
    %8 = tpu.matmul %5, %6, %cst_4 {dimension_numbers = #tpu.dot_dimension_numbers<[2], [2], [1], [1], [0, 0, 0, 1, 1, 1], [0], [0]>} : vector<2x8x8xf32>, vector<2x8x8xf32>, vector<2x8x8xf32> -> vector<2x8x8xf32>
    %cst_5 = arith.constant dense<0xFF800000> : vector<2x8xf32>
    %9 = vector.multi_reduction <maximumf>, %8, %cst_5 [2] : vector<2x8x8xf32> to vector<2x8xf32>
    %10 = vector.shape_cast %9 : vector<2x8xf32> to vector<2x8x1xf32>
    %11 = vector.broadcast %10 : vector<2x8x1xf32> to vector<2x8x8xf32>
    %12 = arith.subf %8, %11 : vector<2x8x8xf32>
    %13 = math.exp %12 : vector<2x8x8xf32>
    %cst_6 = arith.constant dense<0.000000e+00> : vector<2x8xf32>
    %14 = vector.multi_reduction <add>, %13, %cst_6 [2] : vector<2x8x8xf32> to vector<2x8xf32>
    %15 = vector.shape_cast %14 : vector<2x8xf32> to vector<2x8x1xf32>
    %16 = tpu.reciprocal %15 : vector<2x8x1xf32> -> vector<2x8x1xf32>
    %17 = vector.broadcast %16 : vector<2x8x1xf32> to vector<2x8x8xf32>
    %18 = arith.mulf %13, %17 : vector<2x8x8xf32>
    %cst_7 = arith.constant dense<0.000000e+00> : vector<2x8x8xf32>
    %19 = tpu.matmul %18, %7, %cst_7 {dimension_numbers = #tpu.dot_dimension_numbers<[2], [1], [1], [2], [0, 0, 0, 1, 1, 2], [0], [0]>} : vector<2x8x8xf32>, vector<2x8x8xf32>, vector<2x8x8xf32> -> vector<2x8x8xf32>
    %20 = vector.extract_strided_slice %4 {offsets = [0, 0, 8], sizes = [2, 8, 8], strides = [1, 1, 1]} : vector<2x8x96xf32> to vector<2x8x8xf32>
    %21 = vector.extract_strided_slice %4 {offsets = [0, 0, 40], sizes = [2, 8, 8], strides = [1, 1, 1]} : vector<2x8x96xf32> to vector<2x8x8xf32>
    %22 = vector.extract_strided_slice %4 {offsets = [0, 0, 72], sizes = [2, 8, 8], strides = [1, 1, 1]} : vector<2x8x96xf32> to vector<2x8x8xf32>
    %cst_8 = arith.constant dense<0.000000e+00> : vector<2x8x8xf32>
    %23 = tpu.matmul %20, %21, %cst_8 {dimension_numbers = #tpu.dot_dimension_numbers<[2], [2], [1], [1], [0, 0, 0, 1, 1, 1], [0], [0]>} : vector<2x8x8xf32>, vector<2x8x8xf32>, vector<2x8x8xf32> -> vector<2x8x8xf32>
    %cst_9 = arith.constant dense<0xFF800000> : vector<2x8xf32>
    %24 = vector.multi_reduction <maximumf>, %23, %cst_9 [2] : vector<2x8x8xf32> to vector<2x8xf32>
    %25 = vector.shape_cast %24 : vector<2x8xf32> to vector<2x8x1xf32>
    %26 = vector.broadcast %25 : vector<2x8x1xf32> to vector<2x8x8xf32>
    %27 = arith.subf %23, %26 : vector<2x8x8xf32>
    %28 = math.exp %27 : vector<2x8x8xf32>
    %cst_10 = arith.constant dense<0.000000e+00> : vector<2x8xf32>
    %29 = vector.multi_reduction <add>, %28, %cst_10 [2] : vector<2x8x8xf32> to vector<2x8xf32>
    %30 = vector.shape_cast %29 : vector<2x8xf32> to vector<2x8x1xf32>
    %31 = tpu.reciprocal %30 : vector<2x8x1xf32> -> vector<2x8x1xf32>
    %32 = vector.broadcast %31 : vector<2x8x1xf32> to vector<2x8x8xf32>
    %33 = arith.mulf %28, %32 : vector<2x8x8xf32>
    %cst_11 = arith.constant dense<0.000000e+00> : vector<2x8x8xf32>
    %34 = tpu.matmul %33, %22, %cst_11 {dimension_numbers = #tpu.dot_dimension_numbers<[2], [1], [1], [2], [0, 0, 0, 1, 1, 2], [0], [0]>} : vector<2x8x8xf32>, vector<2x8x8xf32>, vector<2x8x8xf32> -> vector<2x8x8xf32>
    %35 = vector.extract_strided_slice %4 {offsets = [0, 0, 16], sizes = [2, 8, 8], strides = [1, 1, 1]} : vector<2x8x96xf32> to vector<2x8x8xf32>
    %36 = vector.extract_strided_slice %4 {offsets = [0, 0, 48], sizes = [2, 8, 8], strides = [1, 1, 1]} : vector<2x8x96xf32> to vector<2x8x8xf32>
    %37 = vector.extract_strided_slice %4 {offsets = [0, 0, 80], sizes = [2, 8, 8], strides = [1, 1, 1]} : vector<2x8x96xf32> to vector<2x8x8xf32>
    %cst_12 = arith.constant dense<0.000000e+00> : vector<2x8x8xf32>
    %38 = tpu.matmul %35, %36, %cst_12 {dimension_numbers = #tpu.dot_dimension_numbers<[2], [2], [1], [1], [0, 0, 0, 1, 1, 1], [0], [0]>} : vector<2x8x8xf32>, vector<2x8x8xf32>, vector<2x8x8xf32> -> vector<2x8x8xf32>
    %cst_13 = arith.constant dense<0xFF800000> : vector<2x8xf32>
    %39 = vector.multi_reduction <maximumf>, %38, %cst_13 [2] : vector<2x8x8xf32> to vector<2x8xf32>
    %40 = vector.shape_cast %39 : vector<2x8xf32> to vector<2x8x1xf32>
    %41 = vector.broadcast %40 : vector<2x8x1xf32> to vector<2x8x8xf32>
    %42 = arith.subf %38, %41 : vector<2x8x8xf32>
    %43 = math.exp %42 : vector<2x8x8xf32>
    %cst_14 = arith.constant dense<0.000000e+00> : vector<2x8xf32>
    %44 = vector.multi_reduction <add>, %43, %cst_14 [2] : vector<2x8x8xf32> to vector<2x8xf32>
    %45 = vector.shape_cast %44 : vector<2x8xf32> to vector<2x8x1xf32>
    %46 = tpu.reciprocal %45 : vector<2x8x1xf32> -> vector<2x8x1xf32>
    %47 = vector.broadcast %46 : vector<2x8x1xf32> to vector<2x8x8xf32>
    %48 = arith.mulf %43, %47 : vector<2x8x8xf32>
    %cst_15 = arith.constant dense<0.000000e+00> : vector<2x8x8xf32>
    %49 = tpu.matmul %48, %37, %cst_15 {dimension_numbers = #tpu.dot_dimension_numbers<[2], [1], [1], [2], [0, 0, 0, 1, 1, 2], [0], [0]>} : vector<2x8x8xf32>, vector<2x8x8xf32>, vector<2x8x8xf32> -> vector<2x8x8xf32>
    %50 = vector.extract_strided_slice %4 {offsets = [0, 0, 24], sizes = [2, 8, 8], strides = [1, 1, 1]} : vector<2x8x96xf32> to vector<2x8x8xf32>
    %51 = vector.extract_strided_slice %4 {offsets = [0, 0, 56], sizes = [2, 8, 8], strides = [1, 1, 1]} : vector<2x8x96xf32> to vector<2x8x8xf32>
    %52 = vector.extract_strided_slice %4 {offsets = [0, 0, 88], sizes = [2, 8, 8], strides = [1, 1, 1]} : vector<2x8x96xf32> to vector<2x8x8xf32>
    %cst_16 = arith.constant dense<0.000000e+00> : vector<2x8x8xf32>
    %53 = tpu.matmul %50, %51, %cst_16 {dimension_numbers = #tpu.dot_dimension_numbers<[2], [2], [1], [1], [0, 0, 0, 1, 1, 1], [0], [0]>} : vector<2x8x8xf32>, vector<2x8x8xf32>, vector<2x8x8xf32> -> vector<2x8x8xf32>
    %cst_17 = arith.constant dense<0xFF800000> : vector<2x8xf32>
    %54 = vector.multi_reduction <maximumf>, %53, %cst_17 [2] : vector<2x8x8xf32> to vector<2x8xf32>
    %55 = vector.shape_cast %54 : vector<2x8xf32> to vector<2x8x1xf32>
    %56 = vector.broadcast %55 : vector<2x8x1xf32> to vector<2x8x8xf32>
    %57 = arith.subf %53, %56 : vector<2x8x8xf32>
    %58 = math.exp %57 : vector<2x8x8xf32>
    %cst_18 = arith.constant dense<0.000000e+00> : vector<2x8xf32>
    %59 = vector.multi_reduction <add>, %58, %cst_18 [2] : vector<2x8x8xf32> to vector<2x8xf32>
    %60 = vector.shape_cast %59 : vector<2x8xf32> to vector<2x8x1xf32>
    %61 = tpu.reciprocal %60 : vector<2x8x1xf32> -> vector<2x8x1xf32>
    %62 = vector.broadcast %61 : vector<2x8x1xf32> to vector<2x8x8xf32>
    %63 = arith.mulf %58, %62 : vector<2x8x8xf32>
    %cst_19 = arith.constant dense<0.000000e+00> : vector<2x8x8xf32>
    %64 = tpu.matmul %63, %52, %cst_19 {dimension_numbers = #tpu.dot_dimension_numbers<[2], [1], [1], [2], [0, 0, 0, 1, 1, 2], [0], [0]>} : vector<2x8x8xf32>, vector<2x8x8xf32>, vector<2x8x8xf32> -> vector<2x8x8xf32>
    %65 = tpu.concatenate %19, %34, %49, %64 in 2 : vector<2x8x8xf32>, vector<2x8x8xf32>, vector<2x8x8xf32>, vector<2x8x8xf32> -> vector<2x8x32xf32>
    %66 = vector.shape_cast %65 : vector<2x8x32xf32> to vector<16x32xf32>
    %c0_20 = arith.constant 0 : index
    %c0_21 = arith.constant 0 : index
    %67 = vector.load %arg3[%c0_20, %c0_21] : memref<32x32xf32, #tpu.memory_space<vmem>>, vector<32x32xf32>
    %cst_22 = arith.constant dense<0.000000e+00> : vector<16x32xf32>
    %68 = tpu.matmul %66, %67, %cst_22 {dimension_numbers = #tpu.dot_dimension_numbers<[1], [0], [0], [1], [0, 0, 1, 1], [], []>} : vector<16x32xf32>, vector<32x32xf32>, vector<16x32xf32> -> vector<16x32xf32>
    %69 = arith.addf %1, %68 : vector<16x32xf32>
    %c0_23 = arith.constant 0 : index
    %c0_24 = arith.constant 0 : index
    %70 = vector.load %arg4[%c0_23, %c0_24] : memref<1x32xf32, #tpu.memory_space<vmem>>, vector<1x32xf32>
    %c0_25 = arith.constant 0 : index
    %c0_26 = arith.constant 0 : index
    %71 = vector.load %arg5[%c0_25, %c0_26] : memref<1x32xf32, #tpu.memory_space<vmem>>, vector<1x32xf32>
    %cst_27 = arith.constant dense<0.000000e+00> : vector<16xf32>
    %72 = vector.multi_reduction <add>, %69, %cst_27 [1] : vector<16x32xf32> to vector<16xf32>
    %73 = vector.shape_cast %72 : vector<16xf32> to vector<16x1xf32>
    %cst_28 = arith.constant 3.200000e+01 : f32
    %74 = vector.broadcast %cst_28 : f32 to vector<16x1xf32>
    %75 = arith.divf %73, %74 : vector<16x1xf32>
    %76 = vector.broadcast %75 : vector<16x1xf32> to vector<16x32xf32>
    %77 = arith.subf %69, %76 : vector<16x32xf32>
    %78 = arith.mulf %77, %77 : vector<16x32xf32>
    %cst_29 = arith.constant dense<0.000000e+00> : vector<16xf32>
    %79 = vector.multi_reduction <add>, %78, %cst_29 [1] : vector<16x32xf32> to vector<16xf32>
    %80 = vector.shape_cast %79 : vector<16xf32> to vector<16x1xf32>
    %cst_30 = arith.constant 3.200000e+01 : f32
    %81 = vector.broadcast %cst_30 : f32 to vector<16x1xf32>
    %82 = arith.divf %80, %81 : vector<16x1xf32>
    %cst_31 = arith.constant 9.99999974E-6 : f32
    %83 = vector.broadcast %cst_31 : f32 to vector<16x1xf32>
    %84 = arith.addf %82, %83 : vector<16x1xf32>
    %85 = math.rsqrt %84 : vector<16x1xf32>
    %86 = vector.broadcast %85 : vector<16x1xf32> to vector<16x32xf32>
    %87 = arith.mulf %77, %86 : vector<16x32xf32>
    %88 = vector.broadcast %70 : vector<1x32xf32> to vector<16x32xf32>
    %89 = arith.mulf %87, %88 : vector<16x32xf32>
    %90 = vector.broadcast %71 : vector<1x32xf32> to vector<16x32xf32>
    %91 = arith.addf %89, %90 : vector<16x32xf32>
    %c0_32 = arith.constant 0 : index
    %c0_33 = arith.constant 0 : index
    %92 = vector.load %arg6[%c0_32, %c0_33] : memref<32x64xf32, #tpu.memory_space<vmem>>, vector<32x64xf32>
    %cst_34 = arith.constant dense<0.000000e+00> : vector<16x64xf32>
    %93 = tpu.matmul %91, %92, %cst_34 {dimension_numbers = #tpu.dot_dimension_numbers<[1], [0], [0], [1], [0, 0, 1, 1], [], []>} : vector<16x32xf32>, vector<32x64xf32>, vector<16x64xf32> -> vector<16x64xf32>
    %c0_35 = arith.constant 0 : index
    %c0_36 = arith.constant 0 : index
    %94 = vector.load %arg7[%c0_35, %c0_36] : memref<1x64xf32, #tpu.memory_space<vmem>>, vector<1x64xf32>
    %95 = vector.broadcast %94 : vector<1x64xf32> to vector<16x64xf32>
    %96 = arith.addf %93, %95 : vector<16x64xf32>
    %cst_37 = arith.constant 5.000000e-01 : f32
    %97 = vector.broadcast %cst_37 : f32 to vector<16x64xf32>
    %98 = arith.mulf %97, %96 : vector<16x64xf32>
    %cst_38 = arith.constant 4.471500e-02 : f32
    %99 = vector.broadcast %cst_38 : f32 to vector<16x64xf32>
    %100 = arith.mulf %99, %96 : vector<16x64xf32>
    %101 = arith.mulf %100, %96 : vector<16x64xf32>
    %102 = arith.mulf %101, %96 : vector<16x64xf32>
    %103 = arith.addf %96, %102 : vector<16x64xf32>
    %cst_39 = arith.constant 0.797884583 : f32
    %104 = vector.broadcast %cst_39 : f32 to vector<16x64xf32>
    %105 = arith.mulf %104, %103 : vector<16x64xf32>
    %106 = math.tanh %105 : vector<16x64xf32>
    %cst_40 = arith.constant 1.000000e+00 : f32
    %107 = vector.broadcast %cst_40 : f32 to vector<16x64xf32>
    %108 = arith.addf %107, %106 : vector<16x64xf32>
    %109 = arith.mulf %98, %108 : vector<16x64xf32>
    %c0_41 = arith.constant 0 : index
    %c0_42 = arith.constant 0 : index
    %110 = vector.load %arg8[%c0_41, %c0_42] : memref<64x32xf32, #tpu.memory_space<vmem>>, vector<64x32xf32>
    %cst_43 = arith.constant dense<0.000000e+00> : vector<16x32xf32>
    %111 = tpu.matmul %109, %110, %cst_43 {dimension_numbers = #tpu.dot_dimension_numbers<[1], [0], [0], [1], [0, 0, 1, 1], [], []>} : vector<16x64xf32>, vector<64x32xf32>, vector<16x32xf32> -> vector<16x32xf32>
    %c0_44 = arith.constant 0 : index
    %c0_45 = arith.constant 0 : index
    %112 = vector.load %arg9[%c0_44, %c0_45] : memref<1x32xf32, #tpu.memory_space<vmem>>, vector<1x32xf32>
    %113 = vector.broadcast %112 : vector<1x32xf32> to vector<16x32xf32>
    %114 = arith.addf %111, %113 : vector<16x32xf32>
    %115 = arith.addf %91, %114 : vector<16x32xf32>
    %c0_46 = arith.constant 0 : index
    %c0_47 = arith.constant 0 : index
    %116 = vector.load %arg10[%c0_46, %c0_47] : memref<1x32xf32, #tpu.memory_space<vmem>>, vector<1x32xf32>
    %c0_48 = arith.constant 0 : index
    %c0_49 = arith.constant 0 : index
    %117 = vector.load %arg11[%c0_48, %c0_49] : memref<1x32xf32, #tpu.memory_space<vmem>>, vector<1x32xf32>
    %cst_50 = arith.constant dense<0.000000e+00> : vector<16xf32>
    %118 = vector.multi_reduction <add>, %115, %cst_50 [1] : vector<16x32xf32> to vector<16xf32>
    %119 = vector.shape_cast %118 : vector<16xf32> to vector<16x1xf32>
    %cst_51 = arith.constant 3.200000e+01 : f32
    %120 = vector.broadcast %cst_51 : f32 to vector<16x1xf32>
    %121 = arith.divf %119, %120 : vector<16x1xf32>
    %122 = vector.broadcast %121 : vector<16x1xf32> to vector<16x32xf32>
    %123 = arith.subf %115, %122 : vector<16x32xf32>
    %124 = arith.mulf %123, %123 : vector<16x32xf32>
    %cst_52 = arith.constant dense<0.000000e+00> : vector<16xf32>
    %125 = vector.multi_reduction <add>, %124, %cst_52 [1] : vector<16x32xf32> to vector<16xf32>
    %126 = vector.shape_cast %125 : vector<16xf32> to vector<16x1xf32>
    %cst_53 = arith.constant 3.200000e+01 : f32
    %127 = vector.broadcast %cst_53 : f32 to vector<16x1xf32>
    %128 = arith.divf %126, %127 : vector<16x1xf32>
    %cst_54 = arith.constant 9.99999974E-6 : f32
    %129 = vector.broadcast %cst_54 : f32 to vector<16x1xf32>
    %130 = arith.addf %128, %129 : vector<16x1xf32>
    %131 = math.rsqrt %130 : vector<16x1xf32>
    %132 = vector.broadcast %131 : vector<16x1xf32> to vector<16x32xf32>
    %133 = arith.mulf %123, %132 : vector<16x32xf32>
    %134 = vector.broadcast %116 : vector<1x32xf32> to vector<16x32xf32>
    %135 = arith.mulf %133, %134 : vector<16x32xf32>
    %136 = vector.broadcast %117 : vector<1x32xf32> to vector<16x32xf32>
    %137 = arith.addf %135, %136 : vector<16x32xf32>
    %138 = vector.shape_cast %137 : vector<16x32xf32> to vector<2x8x32xf32>
    %c0_55 = arith.constant 0 : index
    %c0_56 = arith.constant 0 : index
    %c0_57 = arith.constant 0 : index
    %139 = vector.load %arg12[%c0_55, %c0_56, %c0_57] : memref<2x8x32xf32, #tpu.memory_space<vmem>>, vector<2x8x32xf32>
    tpu.vector_store %arg12[%c0_55, %c0_56, %c0_57], %138 {strides = array<i32>} : memref<2x8x32xf32, #tpu.memory_space<vmem>>, vector<2x8x32xf32>,
    return
  }
  func.func @transform_0(%arg0: i32) -> (i32, i32, i32) {
    %c0_i32 = arith.constant 0 : i32
    %c0_i32_0 = arith.constant 0 : i32
    %c0_i32_1 = arith.constant 0 : i32
    return %arg0, %c0_i32, %c0_i32_0 : i32, i32, i32
  }
  func.func @transform_1(%arg0: i32) -> (i32, i32) {
    %c0_i32 = arith.constant 0 : i32
    %c0_i32_0 = arith.constant 0 : i32
    %c0_i32_1 = arith.constant 0 : i32
    return %c0_i32, %c0_i32_0 : i32, i32
  }
  func.func @transform_2(%arg0: i32) -> (i32, i32) {
    %c0_i32 = arith.constant 0 : i32
    %c0_i32_0 = arith.constant 0 : i32
    %c0_i32_1 = arith.constant 0 : i32
    return %c0_i32, %c0_i32_0 : i32, i32
  }
  func.func @transform_3(%arg0: i32) -> (i32, i32) {
    %c0_i32 = arith.constant 0 : i32
    %c0_i32_0 = arith.constant 0 : i32
    %c0_i32_1 = arith.constant 0 : i32
    return %c0_i32, %c0_i32_0 : i32, i32
  }
  func.func @transform_4(%arg0: i32) -> (i32, i32) {
    %c0_i32 = arith.constant 0 : i32
    %c0_i32_0 = arith.constant 0 : i32
    %c0_i32_1 = arith.constant 0 : i32
    return %c0_i32, %c0_i32_0 : i32, i32
  }
  func.func @transform_5(%arg0: i32) -> (i32, i32) {
    %c0_i32 = arith.constant 0 : i32
    %c0_i32_0 = arith.constant 0 : i32
    %c0_i32_1 = arith.constant 0 : i32
    return %c0_i32, %c0_i32_0 : i32, i32
  }
  func.func @transform_6(%arg0: i32) -> (i32, i32) {
    %c0_i32 = arith.constant 0 : i32
    %c0_i32_0 = arith.constant 0 : i32
    %c0_i32_1 = arith.constant 0 : i32
    return %c0_i32, %c0_i32_0 : i32, i32
  }
  func.func @transform_7(%arg0: i32) -> (i32, i32) {
    %c0_i32 = arith.constant 0 : i32
    %c0_i32_0 = arith.constant 0 : i32
    %c0_i32_1 = arith.constant 0 : i32
    return %c0_i32, %c0_i32_0 : i32, i32
  }
  func.func @transform_8(%arg0: i32) -> (i32, i32) {
    %c0_i32 = arith.constant 0 : i32
    %c0_i32_0 = arith.constant 0 : i32
    %c0_i32_1 = arith.constant 0 : i32
    return %c0_i32, %c0_i32_0 : i32, i32
  }
  func.func @transform_9(%arg0: i32) -> (i32, i32) {
    %c0_i32 = arith.constant 0 : i32
    %c0_i32_0 = arith.constant 0 : i32
    %c0_i32_1 = arith.constant 0 : i32
    return %c0_i32, %c0_i32_0 : i32, i32
  }
  func.func @transform_10(%arg0: i32) -> (i32, i32) {
    %c0_i32 = arith.constant 0 : i32
    %c0_i32_0 = arith.constant 0 : i32
    %c0_i32_1 = arith.constant 0 : i32
    return %c0_i32, %c0_i32_0 : i32, i32
  }
  func.func @transform_11(%arg0: i32) -> (i32, i32, i32) {
    %c0_i32 = arith.constant 0 : i32
    %c0_i32_0 = arith.constant 0 : i32
    %c0_i32_1 = arith.constant 0 : i32
    return %arg0, %c0_i32, %c0_i32_0 : i32, i32, i32
  }
}

</mosaic_0001>

<bundles_post_ra>
// kernel: tpu_custom_call.1
= control target key start
LH: loop header
LB: loop body
LE: loop exit
PB: predicated region body
PF: predicated region fallthrough
CT: control target
= control target key end

     0   :  { %16 = vsyncpa [#allocation3], 0  ;;  %s2562_s0 = inlined_call_operand.hbm [shape: f32[2,8,32], index: 0, kind: input, shape index: {}]   ;;  %s2563_s1 = inlined_call_operand.vmem [shape: f32[32,96], index: 1, kind: input, shape index: {}]   ;;  %s2564_s2 = inlined_call_operand.vmem [shape: f32[32,32], index: 2, kind: input, shape index: {}]   ;;  %s2565_s3 = inlined_call_operand.vmem [shape: f32[1,32], index: 3, kind: input, shape index: {}]   ;;  %s2566_s4 = inlined_call_operand.vmem [shape: f32[1,32], index: 4, kind: input, shape index: {}]   ;;  %s2567_s5 = inlined_call_operand.vmem [shape: f32[32,64], index: 5, kind: input, shape index: {}]   ;;  %s2568_s6 = inlined_call_operand.vmem [shape: f32[1,64], index: 6, kind: input, shape index: {}]   ;;  %s2569_s7 = inlined_call_operand.vmem [shape: f32[64,32], index: 7, kind: input, shape index: {}]   ;;  %s2570_s8 = inlined_call_operand.vmem [shape: f32[1,32], index: 8, kind: input, shape index: {}]   ;;  %s2571_s9 = inlined_call_operand.vmem [shape: f32[1,32], index: 9, kind: input, shape index: {}]   ;;  %s2572_s10 = inlined_call_operand.vmem [shape: f32[1,32], index: 10, kind: input, shape index: {}]   ;;  %s2573_s11 = inlined_call_operand.hbm [shape: f32[2,8,32], index: 11, kind: output, shape index: {}]  }
   0x1   :  { %17 = vsyncpa [#allocation4], 0  ;;  %s2233_s17 = smov [#allocation2]  }
   0x2   :  { %s23_s18 = sshll.u32 %s2233_s17, 4  ;;  %s24_s18 = int_to_ptr.vmem [resolvable:$true] %s23_s18 }
   0x3   :  { %s2197_s19 = scalar_lea.vmem %s24_s18, 256  ;;  %p2202_p1 = scmp.lt.s32.totalorder %s24_s18, %s24_s18 }
   0x4   :  { %p2198_p0 = scmp.ne.s32.totalorder %s24_s18, %s2197_s19  ;;  %p2203_p2 = scmp.lt.s32.totalorder %s2197_s19, %s2197_s19 }
   0x6   :  { %p2204_p3 = por %p2203_p2, %p2202_p1 }
   0x8   :  { %p2205_p4 = pnand %p2204_p3, %p2198_p0 }
   0xa   :  { %2208 = shalt.err (!%p2205_p4)
}
   0xb   :  { %s2234_s20 = smov 128   ;;  %s2235_s21 = smov 8  }
   0xc   :  { %29 = dma.hbm_to_vmem [thread:$0]  %s2562_s0, 256, %s24_s18, [#allocation3], %s2234_s20, %s2234_s20, %s2235_s21  }
   0xd   :  { %2229 = dma.done.wait [#allocation3], 256  }
   0xe   :  { %2230 = vsyncadd [#allocation3], 4294967040  ;;  %vm59_vm0 = vcmask 261120   ;;  %v58_v0 = vld [vmem:[%s2563_s1 + $0x18] sm:$0xff]  ;;  %v57_v1 = vld [vmem:[%s2563_s1 + $0x10] sm:$0xff]  ;;  %v2236_v6 = vmov 0.0  }
   0xf   :  { %1994 = vmatprep.subr.mxu1 %v58_v0  ;;  %v2324_v2 = vld [vmem:[#allocation2] sm:$0xff]  ;;  %v56_v3 = vld [vmem:[%s2563_s1 + $0x8] sm:$0xff]  ;;  %2015 = vmatprep.subr.mxu0 %v2236_v6  ;;  %vm2237_vm1 = vmmov 0   ;;  %vm144_vm2 = vcmask 64512   ;;  %s2239_s12 = smov 64   ;;  %s2240_s13 = smov 88  }
  0x10   :  { %1995 = vmatpush3.msra.mxu1 %v58_v0  ;;  %2002 = vmatprep.mubr.msk.f32.mxu1 %vm59_vm0, %v2324_v2  ;;  %v55_v4 = vld [vmem:[%s2563_s1] sm:$0xff]  ;;  %v2334_v5 = vld [vmem:[#allocation2 + $0x8] sm:$0xff]  ;;  %s2238_s1 = smov 96   ;;  %s2241_s14 = smov 120   ;;  %vm1489_vm3 = vcmask 195584   ;;  %vm1486_vm4 = vcmask 130048  }
  0x11   :  { %1996 = vmatprep.subr.mxu1 %v57_v1  ;;  %2017 = vmatprep.mubr.msk.f32.mxu0 %vm2237_vm1, %v2236_v6  ;;  %s2242_s15 = smov 56   ;;  %s2243_s16 = smov 80   ;;  %vm1749_vm5 = vcmask 523264  }
  0x12   :  { %1997 = vmatpush3.msra.mxu1 %v57_v1  ;;  %s2244_s17 = smov 112   ;;  %s2245_s18 = smov 48  }
  0x13   :  { %1998 = vmatprep.subr.mxu1 %v56_v3  ;;  %s2246_s19 = smov 72   ;;  %s2247_s22 = smov 104  }
  0x14   :  { %1999 = vmatpush3.msra.mxu1 %v56_v3  ;;  %s2248_s23 = smov 40   ;;  %s2249_s24 = smov 16  }
  0x15   :  { %2000 = vmatprep.subr.mxu1 %v55_v4 }
  0x16   :  { %2001 = vmatpush3.msra.mxu1 %v55_v4 }
  0x17   :  { %2003 = vmatmul.mubr.msk.f32.vlgmr.msra.gmra.mxu1 %vm59_vm0, %v2334_v5  ;;  %2005 = vmatprep.subr.mxu1 %v2236_v6 }
  0x18   :  { %2007 = vmatprep.mubr.msk.f32.mxu1 %vm2237_vm1, %v2236_v6 }
  0xd7   :  { %v2344_v7 = vpop.f32.mrf.mxu1 }
  0xd9   :  { %v2346_v8 = vpop.f32.mrf.mxu1 }
  0xda   :  { %142 = vrot.lane.b32.xlu0 %v2346_v8, %s2238_s1 }
  0xde   :  { %220 = vrot.lane.b32.xlu0 %v2344_v7, %s2238_s1 }
 0x14c   :  { %v143_v9 = vpop.permute.xlu0 %142 }
 0x14d   :  { %2006 = vmatpush3.xpose.msk.msra.mxu1 %vm144_vm2, %v143_v9 }
 0x14e   :  { %2010 = vmatprep.subr.mxu1 %v2236_v6 }
 0x150   :  { %2008 = vmatmul.mubr.msk.f32.vlgmr.msra.gmra.mxu1 %vm144_vm2, %v2346_v8  ;;  %v221_v10 = vpop.permute.xlu0 %220 }
 0x151   :  { %2011 = vmatpush3.xpose.msk.msra.mxu1 %vm144_vm2, %v221_v10  ;;  %2012 = vmatprep.mubr.msk.f32.mxu1 %vm2237_vm1, %v2236_v6 }
 0x152   :  { %2020 = vmatprep.subr.mxu1 %v2236_v6 }
 0x154   :  { %2013 = vmatmul.mubr.msk.f32.vlgmr.msra.gmra.mxu1 %vm144_vm2, %v2344_v7 }
 0x155   :  { %2022 = vmatprep.mubr.msk.f32.mxu1 %vm2237_vm1, %v2236_v6 }
 0x210   :  { %v215_v11 = vpop.f32.mrf.mxu1 }
 0x211   :  { %v296_v12 = vsel %vm144_vm2, %v215_v11, -inf }
 0x212   :  { %297 = vmax.xlane.f32.xlu1 %v296_v12  ;;  %v2009_v13 = vpop.f32.mrf.mxu1 }
 0x214   :  { %v292_v14 = vpop.f32.mrf.mxu1 }
 0x215   :  { %v299_v15 = vsel %vm144_vm2, %v292_v14, -inf }
 0x216   :  { %300 = vmax.xlane.f32.xlu1 %v299_v15  ;;  %v2014_v16 = vpop.f32.mrf.mxu1 }
 0x227   :  { %318 = vrot.lane.b32.xlu1 %v2346_v8, %s2239_s12 }
 0x22b   :  { %394 = vrot.lane.b32.xlu1 %v2344_v7, %s2239_s12  ;;  %s2250_s12 = smov 24  }
 0x22f   :  { %472 = vrot.lane.b32.xlu1 %v2346_v8, %s2240_s13 }
 0x233   :  { %550 = vrot.lane.b32.xlu1 %v2344_v7, %s2240_s13 }
 0x29b   :  { %v298_v17 = vpop.xlane.xlu1 %297 }
 0x29c   :  { %v302_v18 = vsub.f32 %v215_v11, %v298_v17 }
 0x29e   :  { %v304_v19 = vmul.f32 1.442695, %v302_v18 }
 0x29f   :  { %v301_v20 = vpop.xlane.xlu1 %300 }
 0x2a0   :  { %2145 = vpow2.f32 %v304_v19  ;;  %v303_v21 = vsub.f32 %v292_v14, %v301_v20 }
 0x2a2   :  { %v306_v22 = vmul.f32 1.442695, %v303_v21 }
 0x2a3   :  { %v319_v23 = vpop.permute.xlu1 %318 }
 0x2a4   :  { %2147 = vpow2.f32 %v306_v22  ;;  %2016 = vmatpush3.msra.mxu0 %v319_v23 }
 0x2a5   :  { %2025 = vmatprep.subr.mxu0 %v2236_v6 }
 0x2a7   :  { %v395_v24 = vpop.permute.xlu1 %394 }
 0x2a8   :  { %2021 = vmatpush3.msra.mxu1 %v395_v24 }
 0x2a9   :  { %2030 = vmatprep.subr.mxu1 %v2236_v6 }
 0x2ab   :  { %v473_v29 = vpop.permute.xlu1 %472 }
 0x2ad   :  { %v2146_v25 = vpop.eup %2145 }
 0x2ae   :  { %v308_v26 = vsel %vm144_vm2, %v2146_v25, 0.0 }
 0x2af   :  { %309 = vadd.xlane.f32.xlu0 %v308_v26  ;;  %v551_v30 = vpop.permute.xlu1 %550 }
 0x2b1   :  { %v2148_v27 = vpop.eup %2147 }
 0x2b2   :  { %v311_v28 = vsel %vm144_vm2, %v2148_v27, 0.0 }
 0x2b3   :  { %312 = vadd.xlane.f32.xlu1 %v311_v28 }
 0x2c4   :  { %548 = vrot.lane.b32.xlu1 %v2344_v7, %s2241_s14 }
 0x2c5   :  { %470 = vrot.lane.b32.xlu0 %v2346_v8, %s2241_s14 }
 0x338   :  { %v310_v31 = vpop.xlane.xlu0 %309 }
 0x339   :  { %2149 = vrcp.f32 %v310_v31 }
 0x33c   :  { %v313_v32 = vpop.xlane.xlu1 %312  ;;  %v471_v37 = vpop.permute.xlu0 %470 }
 0x33d   :  { %2151 = vrcp.f32 %v313_v32 }
 0x340   :  { %v549_v38 = vpop.permute.xlu1 %548 }
 0x346   :  { %v2150_v33 = vpop.eup %2149 }
 0x347   :  { %v316_v34 = vmul.f32 %v2150_v33, %v2146_v25 }
 0x349   :  { %2018 = vmatmul.mubr.msk.f32.vlgmr.msra.gmra.mxu0 %vm144_vm2, %v316_v34 }
 0x34a   :  { %v2152_v35 = vpop.eup %2151  ;;  %2026 = vmatpush3.xpose.msk.msra.mxu0 %vm144_vm2, %v473_v29  ;;  %2027 = vmatprep.mubr.msk.f32.mxu0 %vm2237_vm1, %v2236_v6 }
 0x34b   :  { %v317_v36 = vmul.f32 %v2152_v35, %v2148_v27  ;;  %2035 = vmatprep.subr.mxu0 %v2236_v6 }
 0x34d   :  { %2023 = vmatmul.mubr.msk.f32.vlgmr.msra.gmra.mxu1 %vm144_vm2, %v317_v36  ;;  %2028 = vmatmul.mubr.msk.f32.vlgmr.msra.gmra.mxu0 %vm144_vm2, %v471_v37 }
 0x34e   :  { %2031 = vmatpush3.xpose.msk.msra.mxu1 %vm144_vm2, %v551_v30  ;;  %2032 = vmatprep.mubr.msk.f32.mxu1 %vm2237_vm1, %v2236_v6 }
 0x34f   :  { %2040 = vmatprep.subr.mxu1 %v2236_v6  ;;  %2037 = vmatprep.mubr.msk.f32.mxu0 %vm2237_vm1, %v2236_v6 }
 0x351   :  { %2033 = vmatmul.mubr.msk.f32.vlgmr.msra.gmra.mxu1 %vm144_vm2, %v549_v38 }
 0x352   :  { %2042 = vmatprep.mubr.msk.f32.mxu1 %vm2237_vm1, %v2236_v6 }
 0x409   :  { %v2390_v39 = vpop.f32.mrf.mxu0 }
 0x40b   :  { %v2019_v40 = vpop.f32.mrf.mxu0 }
 0x40d   :  { %v2392_v41 = vpop.f32.mrf.mxu1  ;;  %v544_v42 = vpop.f32.mrf.mxu0 }
 0x40e   :  { %v626_v43 = vsel %vm144_vm2, %v544_v42, -inf }
 0x40f   :  { %v2024_v44 = vpop.f32.mrf.mxu1  ;;  %627 = vmax.xlane.f32.xlu1 %v626_v43  ;;  %v2029_v45 = vpop.f32.mrf.mxu0 }
 0x411   :  { %v622_v46 = vpop.f32.mrf.mxu1 }
 0x412   :  { %v629_v47 = vsel %vm144_vm2, %v622_v46, -inf }
 0x413   :  { %630 = vmax.xlane.f32.xlu0 %v629_v47  ;;  %v2034_v48 = vpop.f32.mrf.mxu1 }
 0x420   :  { %648 = vrot.lane.b32.xlu1 %v2346_v8, %s2242_s15 }
 0x424   :  { %802 = vrot.lane.b32.xlu1 %v2346_v8, %s2243_s16 }
 0x428   :  { %880 = vrot.lane.b32.xlu1 %v2344_v7, %s2243_s16 }
 0x429   :  { %724 = vrot.lane.b32.xlu0 %v2344_v7, %s2242_s15 }
 0x42d   :  { %800 = vrot.lane.b32.xlu0 %v2346_v8, %s2244_s17 }
 0x498   :  { %v628_v49 = vpop.xlane.xlu1 %627 }
 0x499   :  { %v632_v50 = vsub.f32 %v544_v42, %v628_v49 }
 0x49b   :  { %v634_v51 = vmul.f32 1.442695, %v632_v50 }
 0x49c   :  { %v649_v52 = vpop.permute.xlu1 %648  ;;  %v631_v53 = vpop.xlane.xlu0 %630 }
 0x49d   :  { %2153 = vpow2.f32 %v634_v51  ;;  %v633_v54 = vsub.f32 %v622_v46, %v631_v53  ;;  %2036 = vmatpush3.msra.mxu0 %v649_v52 }
 0x49e   :  { %2045 = vmatprep.subr.mxu0 %v2236_v6 }
 0x49f   :  { %v636_v55 = vmul.f32 1.442695, %v633_v54 }
 0x4a0   :  { %v725_v56 = vpop.permute.xlu0 %724  ;;  %v803_v61 = vpop.permute.xlu1 %802 }
 0x4a1   :  { %2155 = vpow2.f32 %v636_v55  ;;  %2041 = vmatpush3.msra.mxu1 %v725_v56 }
 0x4a2   :  { %2050 = vmatprep.subr.mxu1 %v2236_v6 }
 0x4a4   :  { %v881_v62 = vpop.permute.xlu1 %880  ;;  %v801_v10 = vpop.permute.xlu0 %800 }
 0x4aa   :  { %v2154_v57 = vpop.eup %2153 }
 0x4ab   :  { %v638_v58 = vsel %vm144_vm2, %v2154_v57, 0.0 }
 0x4ac   :  { %639 = vadd.xlane.f32.xlu1 %v638_v58 }
 0x4ae   :  { %v2156_v59 = vpop.eup %2155 }
 0x4af   :  { %v641_v60 = vsel %vm144_vm2, %v2156_v59, 0.0 }
 0x4b0   :  { %642 = vadd.xlane.f32.xlu1 %v641_v60 }
 0x4c1   :  { %878 = vrot.lane.b32.xlu1 %v2344_v7, %s2244_s17 }
 0x535   :  { %v640_v63 = vpop.xlane.xlu1 %639 }
 0x536   :  { %2157 = vrcp.f32 %v640_v63 }
 0x539   :  { %v643_v0 = vpop.xlane.xlu1 %642 }
 0x53a   :  { %2159 = vrcp.f32 %v643_v0 }
 0x53d   :  { %v879_v11 = vpop.permute.xlu1 %878 }
 0x543   :  { %v2158_v1 = vpop.eup %2157 }
 0x544   :  { %v646_v3 = vmul.f32 %v2158_v1, %v2154_v57 }
 0x546   :  { %2038 = vmatmul.mubr.msk.f32.vlgmr.msra.gmra.mxu0 %vm144_vm2, %v646_v3 }
 0x547   :  { %v2160_v4 = vpop.eup %2159  ;;  %2046 = vmatpush3.xpose.msk.msra.mxu0 %vm144_vm2, %v803_v61  ;;  %2047 = vmatprep.mubr.msk.f32.mxu0 %vm2237_vm1, %v2236_v6 }
 0x548   :  { %v647_v9 = vmul.f32 %v2160_v4, %v2156_v59  ;;  %2055 = vmatprep.subr.mxu0 %v2236_v6 }
 0x54a   :  { %2043 = vmatmul.mubr.msk.f32.vlgmr.msra.gmra.mxu1 %vm144_vm2, %v647_v9  ;;  %2048 = vmatmul.mubr.msk.f32.vlgmr.msra.gmra.mxu0 %vm144_vm2, %v801_v10 }
 0x54b   :  { %2051 = vmatpush3.xpose.msk.msra.mxu1 %vm144_vm2, %v881_v62  ;;  %2052 = vmatprep.mubr.msk.f32.mxu1 %vm2237_vm1, %v2236_v6 }
 0x54c   :  { %2060 = vmatprep.subr.mxu1 %v2236_v6  ;;  %2057 = vmatprep.mubr.msk.f32.mxu0 %vm2237_vm1, %v2236_v6 }
 0x54e   :  { %2053 = vmatmul.mubr.msk.f32.vlgmr.msra.gmra.mxu1 %vm144_vm2, %v879_v11 }
 0x54f   :  { %2062 = vmatprep.mubr.msk.f32.mxu1 %vm2237_vm1, %v2236_v6 }
 0x606   :  { %v2422_v12 = vpop.f32.mrf.mxu0 }
 0x608   :  { %v2039_v13 = vpop.f32.mrf.mxu0 }
 0x609   :  { %v1495_v13 = vld [vmem:[%s2564_s2 + $0x18] sm:$0xff] }
 0x60a   :  { %v2424_v14 = vpop.f32.mrf.mxu1  ;;  %v874_v15 = vpop.f32.mrf.mxu0 }
 0x60b   :  { %v956_v16 = vsel %vm144_vm2, %v874_v15, -inf }
 0x60c   :  { %v2044_v17 = vpop.f32.mrf.mxu1  ;;  %957 = vmax.xlane.f32.xlu0 %v956_v16  ;;  %v2049_v18 = vpop.f32.mrf.mxu0 }
 0x60e   :  { %v952_v19 = vpop.f32.mrf.mxu1 }
 0x60f   :  { %v959_v20 = vsel %vm144_vm2, %v952_v19, -inf }
 0x610   :  { %960 = vmax.xlane.f32.xlu1 %v959_v20  ;;  %v2054_v21 = vpop.f32.mrf.mxu1 }
 0x621   :  { %978 = vrot.lane.b32.xlu1 %v2346_v8, %s2245_s18 }
 0x622   :  { %1054 = vrot.lane.b32.xlu0 %v2344_v7, %s2245_s18 }
 0x625   :  { %1132 = vrot.lane.b32.xlu1 %v2346_v8, %s2246_s19 }
 0x629   :  { %1210 = vrot.lane.b32.xlu1 %v2344_v7, %s2246_s19 }
 0x62d   :  { %1208 = vrot.lane.b32.xlu1 %v2344_v7, %s2247_s22 }
 0x695   :  { %v958_v22 = vpop.xlane.xlu0 %957 }
 0x696   :  { %v962_v23 = vsub.f32 %v874_v15, %v958_v22  ;;  %v1492_v15 = vld [vmem:[%s2564_s2] sm:$0xff] }
 0x698   :  { %v964_v24 = vmul.f32 1.442695, %v962_v23 }
 0x699   :  { %v961_v25 = vpop.xlane.xlu1 %960  ;;  %v1055_v26 = vpop.permute.xlu0 %1054 }
 0x69a   :  { %2161 = vpow2.f32 %v964_v24  ;;  %v963_v27 = vsub.f32 %v952_v19, %v961_v25  ;;  %2061 = vmatpush3.msra.mxu1 %v1055_v26 }
 0x69b   :  { %2070 = vmatprep.subr.mxu1 %v2236_v6 }
 0x69c   :  { %v966_v28 = vmul.f32 1.442695, %v963_v27 }
 0x69d   :  { %v979_v29 = vpop.permute.xlu1 %978 }
 0x69e   :  { %2163 = vpow2.f32 %v966_v28  ;;  %2056 = vmatpush3.msra.mxu0 %v979_v29 }
 0x69f   :  { %2065 = vmatprep.subr.mxu0 %v2236_v6 }
 0x6a1   :  { %v1133_v36 = vpop.permute.xlu1 %1132 }
 0x6a5   :  { %v1211_v42 = vpop.permute.xlu1 %1210 }
 0x6a7   :  { %v2162_v30 = vpop.eup %2161 }
 0x6a8   :  { %v968_v31 = vsel %vm144_vm2, %v2162_v30, 0.0 }
 0x6a9   :  { %969 = vadd.xlane.f32.xlu0 %v968_v31  ;;  %v1209_v45 = vpop.permute.xlu1 %1208 }
 0x6ab   :  { %v2164_v32 = vpop.eup %2163 }
 0x6ac   :  { %v971_v33 = vsel %vm144_vm2, %v2164_v32, 0.0 }
 0x6ad   :  { %972 = vadd.xlane.f32.xlu0 %v971_v33 }
 0x6c3   :  { %1130 = vrot.lane.b32.xlu0 %v2346_v8, %s2247_s22 }
 0x732   :  { %v970_v34 = vpop.xlane.xlu0 %969 }
 0x733   :  { %2165 = vrcp.f32 %v970_v34 }
 0x736   :  { %v973_v35 = vpop.xlane.xlu0 %972 }
 0x737   :  { %2167 = vrcp.f32 %v973_v35 }
 0x73a   :  { %v1131_v44 = vpop.permute.xlu0 %1130 }
 0x740   :  { %v2166_v37 = vpop.eup %2165 }
 0x741   :  { %v976_v38 = vmul.f32 %v2166_v37, %v2162_v30 }
 0x743   :  { %2058 = vmatmul.mubr.msk.f32.vlgmr.msra.gmra.mxu0 %vm144_vm2, %v976_v38 }
 0x744   :  { %v2168_v40 = vpop.eup %2167  ;;  %2066 = vmatpush3.xpose.msk.msra.mxu0 %vm144_vm2, %v1133_v36  ;;  %2067 = vmatprep.mubr.msk.f32.mxu0 %vm2237_vm1, %v2236_v6 }
 0x745   :  { %v977_v43 = vmul.f32 %v2168_v40, %v2164_v32  ;;  %2075 = vmatprep.subr.mxu0 %v2236_v6 }
 0x747   :  { %2063 = vmatmul.mubr.msk.f32.vlgmr.msra.gmra.mxu1 %vm144_vm2, %v977_v43  ;;  %2068 = vmatmul.mubr.msk.f32.vlgmr.msra.gmra.mxu0 %vm144_vm2, %v1131_v44 }
 0x748   :  { %2071 = vmatpush3.xpose.msk.msra.mxu1 %vm144_vm2, %v1211_v42  ;;  %2072 = vmatprep.mubr.msk.f32.mxu1 %vm2237_vm1, %v2236_v6 }
 0x749   :  { %2080 = vmatprep.subr.mxu1 %v2236_v6  ;;  %2077 = vmatprep.mubr.msk.f32.mxu0 %vm2237_vm1, %v2236_v6 }
 0x74b   :  { %2073 = vmatmul.mubr.msk.f32.vlgmr.msra.gmra.mxu1 %vm144_vm2, %v1209_v45 }
 0x74c   :  { %2082 = vmatprep.mubr.msk.f32.mxu1 %vm2237_vm1, %v2236_v6 }
 0x803   :  { %v1050_v46 = vpop.f32.mrf.mxu0 }
 0x805   :  { %v2059_v47 = vpop.f32.mrf.mxu0 }
 0x806   :  { %v1626_v47 = vld [vmem:[%s2567_s5 + $0x10] sm:$0xff] }
 0x807   :  { %v1126_v48 = vpop.f32.mrf.mxu1  ;;  %v1204_v49 = vpop.f32.mrf.mxu0 }
 0x808   :  { %v1286_v50 = vsel %vm144_vm2, %v1204_v49, -inf }
 0x809   :  { %v2064_v51 = vpop.f32.mrf.mxu1  ;;  %1287 = vmax.xlane.f32.xlu0 %v1286_v50  ;;  %v2069_v52 = vpop.f32.mrf.mxu0 }
 0x80b   :  { %v1282_v53 = vpop.f32.mrf.mxu1 }
 0x80c   :  { %v1289_v54 = vsel %vm144_vm2, %v1282_v53, -inf }
 0x80d   :  { %1290 = vmax.xlane.f32.xlu1 %v1289_v54  ;;  %v2074_v55 = vpop.f32.mrf.mxu1 }
 0x81e   :  { %1308 = vrot.lane.b32.xlu1 %v2346_v8, %s2248_s23 }
 0x822   :  { %1462 = vrot.lane.b32.xlu1 %v2422_v12, %s2235_s21 }
 0x826   :  { %1464 = vrot.lane.b32.xlu1 %v2424_v14, %s2235_s21  ;;  %v1493_v14 = vld [vmem:[%s2564_s2 + $0x8] sm:$0xff] }
 0x82a   :  { %1472 = vrot.lane.b32.xlu1 %v1126_v48, %s2249_s24  ;;  %v1625_v48 = vld [vmem:[%s2567_s5 + $0x8] sm:$0xff] }
 0x892   :  { %v1288_v6 = vpop.xlane.xlu0 %1287 }
 0x893   :  { %v1292_v56 = vsub.f32 %v1204_v49, %v1288_v6  ;;  %v1624_v49 = vld [vmem:[%s2567_s5] sm:$0xff] }
 0x895   :  { %v1294_v57 = vmul.f32 1.442695, %v1292_v56  ;;  %v1924_v56 = vld [vmem:[%s2565_s3] ss:$0 sm:$0xff] }
 0x896   :  { %v1291_v58 = vpop.xlane.xlu1 %1290 }
 0x897   :  { %2169 = vpow2.f32 %v1294_v57  ;;  %v1293_v59 = vsub.f32 %v1282_v53, %v1291_v58  ;;  %v1925_v58 = vld [vmem:[%s2566_s4] ss:$0 sm:$0xff] }
 0x899   :  { %v1296_v60 = vmul.f32 1.442695, %v1293_v59 }
 0x89a   :  { %v1309_v61 = vpop.permute.xlu1 %1308 }
 0x89b   :  { %2171 = vpow2.f32 %v1296_v60  ;;  %2076 = vmatpush3.msra.mxu0 %v1309_v61 }
 0x89c   :  { %2085 = vmatprep.subr.mxu0 %v1495_v13 }
 0x89e   :  { %v1463_v20 = vpop.permute.xlu1 %1462 }
 0x89f   :  { %v1484_v23 = vsel %vm144_vm2, %v2390_v39, %v1463_v20 }
 0x8a2   :  { %v1465_v21 = vpop.permute.xlu1 %1464 }
 0x8a3   :  { %v1485_v28 = vsel %vm144_vm2, %v2392_v41, %v1465_v21 }
 0x8a4   :  { %v2170_v62 = vpop.eup %2169 }
 0x8a5   :  { %v1298_v8 = vsel %vm144_vm2, %v2170_v62, 0.0 }
 0x8a6   :  { %1299 = vadd.xlane.f32.xlu0 %v1298_v8  ;;  %v1473_v24 = vpop.permute.xlu1 %1472 }
 0x8a7   :  { %v1488_v29 = vsel %vm1486_vm4, %v1485_v28, %v1473_v24 }
 0x8a8   :  { %v2172_v63 = vpop.eup %2171 }
 0x8a9   :  { %v1301_v0 = vsel %vm144_vm2, %v2172_v63, 0.0 }
 0x8aa   :  { %1302 = vadd.xlane.f32.xlu0 %v1301_v0  ;;  %v1741_v0 = vld [vmem:[%s2569_s7 + $0x38] sm:$0xff] }
 0x8c0   :  { %1384 = vrot.lane.b32.xlu0 %v2344_v7, %s2248_s23  ;;  %v1494_v7 = vld [vmem:[%s2564_s2 + $0x10] sm:$0xff] }
 0x8c4   :  { %1470 = vrot.lane.b32.xlu0 %v1050_v46, %s2249_s24  ;;  %s2251_s24 = smov [#allocation5]  }
 0x8c5   :  { %s1884_s25 = sshll.u32 %s2251_s24, 4  ;;  %s1885_s25 = int_to_ptr.vmem [resolvable:$true] %s1884_s25 }
 0x8c6   :  { %p2214_p6 = scmp.lt.s32.totalorder %s1885_s25, %s1885_s25 }
 0x92f   :  { %v1300_v1 = vpop.xlane.xlu0 %1299 }
 0x930   :  { %2173 = vrcp.f32 %v1300_v1  ;;  %v1740_v1 = vld [vmem:[%s2569_s7 + $0x30] sm:$0xff] }
 0x933   :  { %v1303_v3 = vpop.xlane.xlu0 %1302 }
 0x934   :  { %2175 = vrcp.f32 %v1303_v3  ;;  %v1739_v3 = vld [vmem:[%s2569_s7 + $0x28] sm:$0xff] }
 0x937   :  { %v1385_v4 = vpop.permute.xlu0 %1384 }
 0x938   :  { %2081 = vmatpush3.msra.mxu1 %v1385_v4  ;;  %v1738_v4 = vld [vmem:[%s2569_s7 + $0x20] sm:$0xff] }
 0x93b   :  { %v1471_v22 = vpop.permute.xlu0 %1470 }
 0x93c   :  { %v1487_v25 = vsel %vm1486_vm4, %v1484_v23, %v1471_v22 }
 0x93d   :  { %v2174_v9 = vpop.eup %2173 }
 0x93e   :  { %v1306_v10 = vmul.f32 %v2174_v9, %v2170_v62  ;;  %v1737_v9 = vld [vmem:[%s2569_s7 + $0x18] sm:$0xff] }
 0x940   :  { %2078 = vmatmul.mubr.msk.f32.vlgmr.msra.gmra.mxu0 %vm144_vm2, %v1306_v10  ;;  %v1736_v10 = vld [vmem:[%s2569_s7 + $0x10] sm:$0xff] }
 0x941   :  { %v2176_v11 = vpop.eup %2175  ;;  %2086 = vmatpush3.msra.mxu0 %v1495_v13  ;;  %v1926_v13 = vld [vmem:[%s2568_s6] ss:$0 sm:$0xff] }
 0x942   :  { %v1307_v12 = vmul.f32 %v2176_v11, %v2172_v63  ;;  %2087 = vmatprep.subr.mxu0 %v1494_v7  ;;  %v1735_v11 = vld [vmem:[%s2569_s7 + $0x8] sm:$0xff] }
 0x943   :  { %2088 = vmatpush3.msra.mxu0 %v1494_v7 }
 0x944   :  { %2083 = vmatmul.mubr.msk.f32.vlgmr.msra.gmra.mxu1 %vm144_vm2, %v1307_v12  ;;  %2089 = vmatprep.subr.mxu0 %v1493_v14  ;;  %v1734_v12 = vld [vmem:[%s2569_s7] sm:$0xff] }
 0x945   :  { %2090 = vmatpush3.msra.mxu0 %v1493_v14 }
 0x946   :  { %2091 = vmatprep.subr.mxu0 %v1492_v15 }
 0x947   :  { %2092 = vmatpush3.msra.mxu0 %v1492_v15 }
 0x948   :  { %2107 = vmatprep.subr.mxu0 %v1741_v0 }
 0xa00   :  { %v1380_v16 = vpop.f32.mrf.mxu0 }
 0xa01   :  { %1478 = vrot.lane.b32.xlu0 %v1380_v16, %s2250_s12 }
 0xa02   :  { %v2079_v17 = vpop.f32.mrf.mxu0 }
 0xa04   :  { %v1456_v18 = vpop.f32.mrf.mxu1 }
 0xa05   :  { %1480 = vrot.lane.b32.xlu1 %v1456_v18, %s2250_s12 }
 0xa06   :  { %v2084_v19 = vpop.f32.mrf.mxu1 }
 0xa73   :  { %v1479_v26 = vpop.permute.xlu0 %1478 }
 0xa74   :  { %v1490_v27 = vsel %vm1489_vm3, %v1487_v25, %v1479_v26 }
 0xa75   :  { %2093 = vmatprep.mubr.msk.f32.mxu0 %vm59_vm0, %v1490_v27 }
 0xa77   :  { %v1481_v30 = vpop.permute.xlu1 %1480 }
 0xa78   :  { %v1491_v31 = vsel %vm1489_vm3, %v1488_v29, %v1481_v30 }
 0xa79   :  { %2094 = vmatmul.mubr.msk.f32.vlgmr.msra.gmra.mxu0 %vm59_vm0, %v1491_v31 }
 0xa7a   :  { %2108 = vmatpush3.msra.mxu0 %v1741_v0 }
 0xa7b   :  { %2109 = vmatprep.subr.mxu0 %v1740_v1 }
 0xa7c   :  { %2110 = vmatpush3.msra.mxu0 %v1740_v1 }
 0xa7d   :  { %2111 = vmatprep.subr.mxu0 %v1739_v3 }
 0xa7e   :  { %2112 = vmatpush3.msra.mxu0 %v1739_v3 }
 0xa7f   :  { %2113 = vmatprep.subr.mxu0 %v1738_v4 }
 0xa80   :  { %2114 = vmatpush3.msra.mxu0 %v1738_v4 }
 0xa81   :  { %2115 = vmatprep.subr.mxu0 %v1737_v9 }
 0xa82   :  { %2116 = vmatpush3.msra.mxu0 %v1737_v9 }
 0xa83   :  { %2117 = vmatprep.subr.mxu0 %v1736_v10 }
 0xa84   :  { %2118 = vmatpush3.msra.mxu0 %v1736_v10 }
 0xa85   :  { %2119 = vmatprep.subr.mxu0 %v1735_v11 }
 0xa86   :  { %2120 = vmatpush3.msra.mxu0 %v1735_v11 }
 0xa87   :  { %2121 = vmatprep.subr.mxu0 %v1734_v12 }
 0xa88   :  { %2122 = vmatpush3.msra.mxu0 %v1734_v12 }
 0xb39   :  { %v2095_v32 = vpop.f32.mrf.mxu0 }
 0xb3a   :  { %v1578_v33 = vadd.f32 %v2095_v32, %v2334_v5 }
 0xb3b   :  { %v1568_v34 = vpop.f32.mrf.mxu0 }
 0xb3c   :  { %v1577_v39 = vadd.f32 %v1568_v34, %v2324_v2  ;;  %v1584_v35 = vsel %vm59_vm0, %v1578_v33, 0.0  ;;  %v1627_v2 = vld [vmem:[%s2567_s5 + $0x18] sm:$0xff]  ;;  %s2209_s5 = scalar_lea.vmem %s1885_s25, 256 }
 0xb3d   :  { %1585 = vadd.xlane.f32.xlu1 %v1584_v35  ;;  %2096 = vmatprep.subr.mxu1 %v1627_v2  ;;  %p2210_p5 = scmp.ne.s32.totalorder %s1885_s25, %s2209_s5  ;;  %p2215_p7 = scmp.lt.s32.totalorder %s2209_s5, %s2209_s5 }
 0xb3e   :  { %v1581_v36 = vsel %vm59_vm0, %v1577_v39, 0.0  ;;  %2097 = vmatpush3.msra.mxu1 %v1627_v2 }
 0xb3f   :  { %1582 = vadd.xlane.f32.xlu0 %v1581_v36  ;;  %2098 = vmatprep.subr.mxu1 %v1626_v47  ;;  %p2216_p8 = por %p2215_p7, %p2214_p6 }
 0xb40   :  { %2099 = vmatpush3.msra.mxu1 %v1626_v47 }
 0xb41   :  { %2100 = vmatprep.subr.mxu1 %v1625_v48  ;;  %p2217_p9 = pnand %p2216_p8, %p2210_p5 }
 0xb42   :  { %2101 = vmatpush3.msra.mxu1 %v1625_v48 }
 0xb43   :  { %2102 = vmatprep.subr.mxu1 %v1624_v49 }
 0xb44   :  { %2103 = vmatpush3.msra.mxu1 %v1624_v49 }
 0xbc6   :  { %v1586_v37 = vpop.xlane.xlu1 %1585 }
 0xbc7   :  { %v1589_v38 = vmul.f32 0.03125, %v1586_v37 }
 0xbc8   :  { %v1583_v41 = vpop.xlane.xlu0 %1582 }
 0xbc9   :  { %v1588_v40 = vmul.f32 0.03125, %v1583_v41  ;;  %v1591_v42 = vsub.f32 %v1578_v33, %v1589_v38 }
 0xbcb   :  { %v1590_v43 = vsub.f32 %v1577_v39, %v1588_v40  ;;  %v1593_v46 = vmul.f32 %v1591_v42, %v1591_v42  ;;  %v1929_v39 = vld [vmem:[%s2570_s8] ss:$0 sm:$0xff] }
 0xbcd   :  { %v1592_v44 = vmul.f32 %v1590_v43, %v1590_v43  ;;  %v1597_v5 = vsel %vm59_vm0, %v1593_v46, 0.0 }
 0xbcf   :  { %v1594_v45 = vsel %vm59_vm0, %v1592_v44, 0.0 }
 0xbd0   :  { %1595 = vadd.xlane.f32.xlu0 %v1594_v45 }
 0xbd4   :  { %1598 = vadd.xlane.f32.xlu0 %v1597_v5 }
 0xc59   :  { %v1596_v50 = vpop.xlane.xlu0 %1595 }
 0xc5a   :  { %v1600_v51 = vmul.f32 0.03125, %v1596_v50 }
 0xc5c   :  { %v1602_v52 = vadd.f32 1e-05, %v1600_v51 }
 0xc5d   :  { %v1599_v53 = vpop.xlane.xlu0 %1598 }
 0xc5e   :  { %2177 = vrsqrt.f32 %v1602_v52  ;;  %v1601_v54 = vmul.f32 0.03125, %v1599_v53 }
 0xc60   :  { %v1603_v55 = vadd.f32 1e-05, %v1601_v54 }
 0xc62   :  { %2179 = vrsqrt.f32 %v1603_v55 }
 0xc6b   :  { %v2178_v6 = vpop.eup %2177 }
 0xc6c   :  { %v1606_v57 = vmul.f32 %v2178_v6, %v1590_v43 }
 0xc6e   :  { %v1614_v59 = vmul.f32 %v1924_v56, %v1606_v57 }
 0xc6f   :  { %v2180_v60 = vpop.eup %2179 }
 0xc70   :  { %v1607_v61 = vmul.f32 %v2180_v60, %v1591_v42  ;;  %v2508_v62 = vadd.f32 %v1925_v58, %v1614_v59 }
 0xc72   :  { %v1615_v8 = vmul.f32 %v1924_v56, %v1607_v61  ;;  %2104 = vmatprep.mubr.msk.f32.mxu1 %vm59_vm0, %v2508_v62  ;;  %v1933_v61 = vld [vmem:[%s2572_s10] ss:$0 sm:$0xff] }
 0xc74   :  { %v1623_v63 = vadd.f32 %v1925_v58, %v1615_v8  ;;  %v1932_v58 = vld [vmem:[%s2571_s9] ss:$0 sm:$0xff] }
 0xc76   :  { %2105 = vmatmul.mubr.msk.f32.vlgmr.msra.gmra.mxu1 %vm59_vm0, %v1623_v63 }
 0xd36   :  { %v2106_v7 = vpop.f32.mrf.mxu1 }
 0xd37   :  { %v1713_v14 = vadd.f32 %v2106_v7, %v1926_v13 }
 0xd38   :  { %v1707_v15 = vpop.f32.mrf.mxu1 }
 0xd39   :  { %v1719_v16 = vmul.f32 0.044715, %v1713_v14  ;;  %v1708_v17 = vadd.f32 %v1926_v13, %v1707_v15  ;;  %v1717_v32 = vmul.f32 0.5, %v1713_v14 }
 0xd3b   :  { %v1721_v18 = vmul.f32 %v1719_v16, %v1713_v14  ;;  %v1718_v19 = vmul.f32 0.044715, %v1708_v17  ;;  %v1716_v30 = vmul.f32 0.5, %v1708_v17 }
 0xd3d   :  { %v1723_v20 = vmul.f32 %v1721_v18, %v1713_v14  ;;  %v1720_v21 = vmul.f32 %v1718_v19, %v1708_v17 }
 0xd3f   :  { %v1725_v22 = vadd.f32 %v1723_v20, %v1713_v14  ;;  %v1722_v23 = vmul.f32 %v1720_v21, %v1708_v17 }
 0xd41   :  { %v1727_v24 = vmul.f32 0.7978846, %v1725_v22  ;;  %v1724_v25 = vadd.f32 %v1722_v23, %v1708_v17 }
 0xd43   :  { %2181 = vtanh.f32 %v1727_v24  ;;  %v1726_v26 = vmul.f32 0.7978846, %v1724_v25 }
 0xd45   :  { %2183 = vtanh.f32 %v1726_v26 }
 0xd50   :  { %v2182_v27 = vpop.eup %2181 }
 0xd51   :  { %v1731_v29 = vadd.f32 1.0, %v2182_v27 }
 0xd52   :  { %v2184_v28 = vpop.eup %2183 }
 0xd53   :  { %v1730_v31 = vadd.f32 1.0, %v2184_v28  ;;  %v1733_v34 = vmul.f32 %v1731_v29, %v1717_v32 }
 0xd55   :  { %v1732_v33 = vmul.f32 %v1730_v31, %v1716_v30 }
 0xd57   :  { %2123 = vmatprep.mubr.msk.f32.mxu0 %vm1749_vm5, %v1732_v33 }
 0xd58   :  { %2124 = vmatmul.mubr.msk.f32.vlgmr.msra.gmra.mxu0 %vm1749_vm5, %v1733_v34 }
 0xe18   :  { %v2125_v35 = vpop.f32.mrf.mxu0 }
 0xe19   :  { %v1828_v36 = vadd.f32 %v2125_v35, %v1929_v39 }
 0xe1a   :  { %v1822_v37 = vpop.f32.mrf.mxu0 }
 0xe1b   :  { %v1823_v38 = vadd.f32 %v1929_v39, %v1822_v37  ;;  %v1832_v41 = vadd.f32 %v1828_v36, %v1623_v63 }
 0xe1d   :  { %v1838_v40 = vsel %vm59_vm0, %v1832_v41, 0.0  ;;  %v1831_v42 = vadd.f32 %v1823_v38, %v2508_v62 }
 0xe1e   :  { %1839 = vadd.xlane.f32.xlu0 %v1838_v40 }
 0xe1f   :  { %v1835_v43 = vsel %vm59_vm0, %v1831_v42, 0.0 }
 0xe20   :  { %1836 = vadd.xlane.f32.xlu1 %v1835_v43 }
 0xea7   :  { %v1840_v44 = vpop.xlane.xlu0 %1839 }
 0xea8   :  { %v1842_v45 = vmul.f32 0.03125, %v1840_v44 }
 0xea9   :  { %v1837_v46 = vpop.xlane.xlu1 %1836 }
 0xeaa   :  { %v1844_v5 = vsub.f32 %v1832_v41, %v1842_v45  ;;  %v1841_v2 = vmul.f32 0.03125, %v1837_v46 }
 0xeac   :  { %v1843_v47 = vsub.f32 %v1831_v42, %v1841_v2  ;;  %v1846_v48 = vmul.f32 %v1844_v5, %v1844_v5 }
 0xeae   :  { %v1850_v49 = vsel %vm59_vm0, %v1846_v48, 0.0  ;;  %v1845_v50 = vmul.f32 %v1843_v47, %v1843_v47 }
 0xeaf   :  { %1851 = vadd.xlane.f32.xlu0 %v1850_v49 }
 0xeb0   :  { %v1847_v51 = vsel %vm59_vm0, %v1845_v50, 0.0 }
 0xeb1   :  { %1848 = vadd.xlane.f32.xlu1 %v1847_v51 }
 0xf38   :  { %v1852_v52 = vpop.xlane.xlu0 %1851 }
 0xf39   :  { %v1854_v53 = vmul.f32 0.03125, %v1852_v52 }
 0xf3a   :  { %v1849_v54 = vpop.xlane.xlu1 %1848 }
 0xf3b   :  { %v1856_v55 = vadd.f32 1e-05, %v1854_v53  ;;  %v1853_v6 = vmul.f32 0.03125, %v1849_v54 }
 0xf3d   :  { %2185 = vrsqrt.f32 %v1856_v55  ;;  %v1855_v56 = vadd.f32 1e-05, %v1853_v6 }
 0xf3f   :  { %2187 = vrsqrt.f32 %v1855_v56 }
 0xf4a   :  { %v2186_v57 = vpop.eup %2185 }
 0xf4b   :  { %v1860_v59 = vmul.f32 %v2186_v57, %v1844_v5 }
 0xf4c   :  { %v2188_v60 = vpop.eup %2187 }
 0xf4d   :  { %v1859_v62 = vmul.f32 %v2188_v60, %v1843_v47  ;;  %v1868_v8 = vmul.f32 %v1932_v58, %v1860_v59 }
 0xf4f   :  { %v1867_v63 = vmul.f32 %v1932_v58, %v1859_v62  ;;  %v1876_v0 = vadd.f32 %v1933_v61, %v1868_v8 }
 0xf51   :  { %v1875_v1 = vadd.f32 %v1933_v61, %v1867_v63  ;;  %1878 = vst.msk [vmem:[#allocation5 + $0x8] sm:$0xff] %vm59_vm0, %v1876_v0 }
 0xf53   :  { %1877 = vst.msk [vmem:[#allocation5] sm:$0xff] %vm59_vm0, %v1875_v1 }
 0xf54   :  { %2220 = shalt.err (!%p2217_p9)
}
 0xf55   :  { %1890 = dma.vmem_to_hbm [thread:$0]  %s1885_s25, 256, %s2573_s11, [#allocation4], %s2234_s20, %s2234_s20, %s2235_s21  }
 0xf56   :  { %2231 = dma.done.wait [#allocation4], 256  }
 0xf57   :  { %2232 = vsyncadd [#allocation4], 4294967040 }
 0xf58   :  { %1894 = vsyncpa [#allocation3], 1 }
 0xf59   :  { %1895 = vsyncpa [#allocation4], 1 }

</bundles_post_ra>
